<compile_context>
chip_gen: v7x
topology: tpu7x:2x2x1
jax: 0.10.0
libtpu: 0.0.40
codegen_flags: <defaults>
</compile_context>

<pallas_src>
import functools

import jax
import jax.numpy as jnp
from jax.experimental import pallas as pl
from jax.experimental.pallas import tpu as pltpu


def _round_up(v, m):
    return ((v + m - 1) // m) * m


def _softhebb_stage1_kernel(lamb_ref, x_ref, wt_ref, winv_ref, lp_ref,
                            t_ref, m_ref):
    """Per batch-tile: bf16 matmul + folded norms + RePU + u**lamb * exp(logprior).

    Outputs:
      t_ref : (TB, Dout_pad) bf16 -- u**lamb * exp(logprior)  (un-normalized)
      m_ref : (8, 128)       f32  -- tile-wide max(u), broadcast over the block
                                     (reduced to the global max in the wrapper)
    """
    x = x_ref[...]                       # (TB, Din) f32
    lamb = lamb_ref[0, 0]                # scalar f32 from SMEM

    # Row-wise inverse L2 norm of x in f32 (folded in AFTER the matmul, so
    # x_n is never materialized).
    inv_xn = pl.reciprocal(
        jnp.sqrt(jnp.sum(x * x, axis=1, keepdims=True)) + 1e-9, approx=True)

    # bf16 MXU matmul, f32 accumulation.  Weight is pre-transposed to
    # (Din, Dout_pad): canonical (B,K)@(K,N) orientation, lane-dense output.
    a_raw = jnp.dot(x.astype(jnp.bfloat16), wt_ref[...],
                    preferred_element_type=jnp.float32)      # (TB, Dout_pad)

    # Fold both normalizations as post-matmul scaling:
    #   (x/||x||) @ (w/||w||).T == (x @ w.T) * (1/||x||) * (1/||w||)
    a = a_raw * inv_xn * winv_ref[...]

    # RePU inhibition, triangle=False -> setpoint = 0
    u = jnp.maximum(a, 0.0)

    # t = u**lamb * exp(logprior), fused into a single exp (EUP).
    # u == 0 is guarded explicitly (log(0) = -inf -> exp -> 0 anyway).
    t = jnp.where(u > 0.0,
                  jnp.exp(lamb * jnp.log(u) + lp_ref[...]),
                  0.0)
    t_ref[...] = t.astype(t_ref.dtype)

    # Per-tile max of u.  Padded rows/columns contribute u == 0 <= real max.
    m_row = jnp.max(u, axis=1, keepdims=True)                # (TB, 1)
    m_all = jnp.max(m_row, axis=0, keepdims=True)            # (1, 1)
    m_ref[...] = jnp.broadcast_to(m_all, (8, 128))


def _softhebb_stage2_kernel(c_ref, t_ref, y_ref):
    """Per batch-tile row normalization with the global-max eps term folded in.

      y = t / (sum_j t_j + 1e-9 * (max_u + 1e-9)**lamb)

    Algebraically identical to:
      un = u/(max_u+1e-9); ulamb = un**lamb * exp(lp); y = ulamb/(sum+1e-9).
    """
    t = t_ref[...].astype(jnp.float32)                       # (TB, Dout_pad)
    c = c_ref[0, 0]                                          # scalar (SMEM)
    s = jnp.sum(t, axis=1, keepdims=True)                    # (TB, 1)
    inv = pl.reciprocal(s + c, approx=True)
    # s == 0 rows (all-negative activations, or batch padding) -> y = 0,
    # matching 0 / (0 + eps) in the reference.
    y_ref[...] = jnp.where(s > 0.0, t * inv, 0.0)


@functools.partial(jax.jit, static_argnames=("tb",))
def softhebb_forward(x, weight, logprior, lamb, *, tb=512):
    """SoftHebbLayer forward (eval path).

    x: (B, Din), weight: (Dout, Din), logprior: (Dout,), lamb: scalar.
    Returns y: (B, Dout) float32.
    """
    B, Din = x.shape
    Dout = weight.shape[0]

    x = x.astype(jnp.float32)
    weight = weight.astype(jnp.float32)
    lamb_f = jnp.asarray(lamb, jnp.float32)

    # ---- static (weight-side) precomputation --------------------------------
    dout_p = _round_up(Dout, 128)                 # lane-dense output columns
    w_inv = 1.0 / (jnp.sqrt(jnp.sum(weight * weight, axis=1)) + 1e-9)  # f32
    wt = weight.T.astype(jnp.bfloat16)            # (Din, Dout) MXU orientation
    pad_c = dout_p - Dout
    if pad_c:
        wt = jnp.pad(wt, ((0, 0), (0, pad_c)))
        w_inv = jnp.pad(w_inv, (0, pad_c))        # padded cols: a == 0 -> u == 0
        lp = jnp.pad(logprior.astype(jnp.float32), (0, pad_c))
    else:
        lp = logprior.astype(jnp.float32)
    w_inv = w_inv.reshape(1, dout_p)
    lp = lp.reshape(1, dout_p)

    # ---- batch tiling --------------------------------------------------------
    # Tile rows are multiples of 16 so the bf16 intermediate is always
    # sublane-aligned, for any batch size.
    tb_eff = min(_round_up(tb, 16), _round_up(B, 16))
    b_pad = _round_up(B, tb_eff)
    nb = b_pad // tb_eff
    if b_pad != B:
        x = jnp.pad(x, ((0, b_pad - B), (0, 0)))  # zero rows -> u == 0 -> y == 0

    lamb_smem = lamb_f.reshape(1, 1)

    # ---- stage 1: fused matmul + epilogue, tiled & pipelined over batch -----
    t, tile_max = pl.pallas_call(
        _softhebb_stage1_kernel,
        out_shape=(
            jax.ShapeDtypeStruct((b_pad, dout_p), jnp.bfloat16),
            jax.ShapeDtypeStruct((nb * 8, 128), jnp.float32),
        ),
        grid_spec=pltpu.PrefetchScalarGridSpec(
            num_scalar_prefetch=0,
            grid=(nb,),
            in_specs=[
                pl.BlockSpec(memory_space=pltpu.MemorySpace.SMEM),   # lamb (1,1)
                pl.BlockSpec((tb_eff, Din), lambda i: (i, 0)),       # x tile
                pl.BlockSpec((Din, dout_p), lambda i: (0, 0)),       # weight (resident)
                pl.BlockSpec((1, dout_p), lambda i: (0, 0)),         # 1/||w_row||
                pl.BlockSpec((1, dout_p), lambda i: (0, 0)),         # logprior
            ],
            out_specs=[
                pl.BlockSpec((tb_eff, dout_p), lambda i: (i, 0)),    # t (bf16)
                pl.BlockSpec((8, 128), lambda i: (i, 0)),            # per-tile max(u)
            ],
        ),
        compiler_params=pltpu.CompilerParams(
            dimension_semantics=("parallel",)),
    )(lamb_smem, x, wt, w_inv, lp)

    # ---- global max(u): tiny cross-tile reduction ---------------------------
    max_u = jnp.max(tile_max)
    # eps term of the reference, folded: 1e-9 * (max_u + 1e-9) ** lamb
    c = (1e-9 * jnp.power(max_u + 1e-9, lamb_f)).astype(jnp.float32).reshape(1, 1)

    # ---- stage 2: lane-dense row normalization, tiled over batch ------------
    y = pl.pallas_call(
        _softhebb_stage2_kernel,
        out_shape=jax.ShapeDtypeStruct((b_pad, dout_p), jnp.float32),
        grid_spec=pltpu.PrefetchScalarGridSpec(
            num_scalar_prefetch=0,
            grid=(nb,),
            in_specs=[
                pl.BlockSpec(memory_space=pltpu.MemorySpace.SMEM),   # c (1,1)
                pl.BlockSpec((tb_eff, dout_p), lambda i: (i, 0)),    # t tile
            ],
            out_specs=pl.BlockSpec((tb_eff, dout_p), lambda i: (i, 0)),
        ),
        compiler_params=pltpu.CompilerParams(
            dimension_semantics=("parallel",)),
    )(c, t)

    return y[:B, :Dout]


def softhebb_reference(x, weight, logprior, lamb):
    """Pure-JAX f32 reference mirroring the PyTorch module."""
    x_n = x / (jnp.linalg.norm(x, axis=1, keepdims=True) + 1e-9)
    W = weight / (jnp.linalg.norm(weight, axis=1, keepdims=True) + 1e-9)
    a = x_n @ W.T
    u = jnp.maximum(a, 0.0)
    un = u / (jnp.max(u) + 1e-9)
    ulamb = un ** lamb * jnp.exp(logprior)[None, :]
    return ulamb / (jnp.sum(ulamb, axis=1, keepdims=True) + 1e-9)


if __name__ == "__main__":
    # Small deterministic shapes consistent with the module's Linear-style forward.
    B, inputdim, outputdim = 8, 64, 32
    initial_weight_norm = 0.01
    initial_lambda = 4.0

    key = jax.random.PRNGKey(0)
    kx, kw = jax.random.split(key)

    x = jax.random.normal(kx, (B, inputdim), dtype=jnp.float32)

    # weight = randn((outputdim, inputdim)) with rows rescaled to norm 0.01
    # (mirrors set_weight_norms_to(initial_weight_norm))
    w_raw = jax.random.normal(kw, (outputdim, inputdim), dtype=jnp.float32)
    w_norms = jnp.linalg.norm(w_raw, axis=1, keepdims=True)
    weight = initial_weight_norm * w_raw / (w_norms + 1e-10)

    logprior = jnp.zeros((outputdim,), dtype=jnp.float32)
    lamb = jnp.float32(initial_lambda)

    y = softhebb_forward(x, weight, logprior, lamb)
    jax.block_until_ready(y)

    y_ref = softhebb_reference(x, weight, logprior, lamb)
    assert y.shape == (B, outputdim)
    assert bool(jnp.all(jnp.isfinite(y)))
    # bf16 MXU matmul + bf16 intermediate + approx reciprocals -> looser
    # tolerance vs. the f32 reference.
    assert jnp.allclose(y, y_ref, rtol=5e-2, atol=3e-3), (
        "mismatch vs reference, max abs err = "
        + str(float(jnp.max(jnp.abs(y - y_ref)))))

    print("KERNEL_OK")
</pallas_src>

<mosaic_0001>
module attributes {stable_mosaic.version = 11 : i64} {
  func.func @_softhebb_stage2_kernel(%arg0: i32, %arg1: memref<1x1xf32, #tpu.memory_space<smem>>, %arg2: memref<16x128xbf16, #tpu.memory_space<vmem>>, %arg3: memref<16x128xf32, #tpu.memory_space<vmem>>) attributes {dimension_semantics = [#tpu.dimension_semantics<parallel>], iteration_bounds = array<i64: 1>, scalar_prefetch = 0 : i64, scratch_operands = 0 : i64, tpu.core_type = #tpu.core_type<tc>, window_params = [{transform_indices = @transform_0, window_bounds = array<i64: 1, 1>}, {transform_indices = @transform_1, window_bounds = array<i64: 16, 128>}, {transform_indices = @transform_2, window_bounds = array<i64: 16, 128>}]} {
    %c0 = arith.constant 0 : index
    %c0_0 = arith.constant 0 : index
    %0 = vector.load %arg2[%c0, %c0_0] : memref<16x128xbf16, #tpu.memory_space<vmem>>, vector<16x128xbf16>
    %1 = arith.extf %0 : vector<16x128xbf16> to vector<16x128xf32>
    %c0_1 = arith.constant 0 : index
    %c0_2 = arith.constant 0 : index
    %2 = memref.load %arg1[%c0_1, %c0_2] : memref<1x1xf32, #tpu.memory_space<smem>>
    %cst = arith.constant dense<0.000000e+00> : vector<16xf32>
    %3 = vector.multi_reduction <add>, %1, %cst [1] : vector<16x128xf32> to vector<16xf32>
    %4 = vector.shape_cast %3 : vector<16xf32> to vector<16x1xf32>
    %5 = vector.broadcast %2 : f32 to vector<16x1xf32>
    %6 = arith.addf %4, %5 : vector<16x1xf32>
    %7 = tpu.reciprocal %6 {approx = true} : vector<16x1xf32> -> vector<16x1xf32>
    %cst_3 = arith.constant 0.000000e+00 : f32
    %8 = vector.broadcast %cst_3 : f32 to vector<16x1xf32>
    %9 = arith.cmpf ogt, %4, %8 : vector<16x1xf32>
    %10 = vector.broadcast %7 : vector<16x1xf32> to vector<16x128xf32>
    %11 = arith.mulf %1, %10 : vector<16x128xf32>
    %cst_4 = arith.constant 0.000000e+00 : f32
    %12 = vector.shape_cast %9 : vector<16x1xi1> to vector<16x1xi1>
    %13 = vector.broadcast %12 : vector<16x1xi1> to vector<16x128xi1>
    %14 = vector.broadcast %cst_4 : f32 to vector<16x128xf32>
    %15 = arith.select %13, %11, %14 : vector<16x128xi1>, vector<16x128xf32>
    %c0_5 = arith.constant 0 : index
    %c0_6 = arith.constant 0 : index
    %16 = vector.load %arg3[%c0_5, %c0_6] : memref<16x128xf32, #tpu.memory_space<vmem>>, vector<16x128xf32>
    tpu.vector_store %arg3[%c0_5, %c0_6], %15 {strides = array<i32>} : memref<16x128xf32, #tpu.memory_space<vmem>>, vector<16x128xf32>,
    return
  }
  func.func @transform_0(%arg0: i32) -> (i32, i32) {
    %c0_i32 = arith.constant 0 : i32
    %c0_i32_0 = arith.constant 0 : i32
    %c0_i32_1 = arith.constant 0 : i32
    return %c0_i32, %c0_i32_0 : i32, i32
  }
  func.func @transform_1(%arg0: i32) -> (i32, i32) {
    %c0_i32 = arith.constant 0 : i32
    %c0_i32_0 = arith.constant 0 : i32
    return %arg0, %c0_i32 : i32, i32
  }
  func.func @transform_2(%arg0: i32) -> (i32, i32) {
    %c0_i32 = arith.constant 0 : i32
    %c0_i32_0 = arith.constant 0 : i32
    return %arg0, %c0_i32 : i32, i32
  }
}

module attributes {stable_mosaic.version = 11 : i64} {
  func.func @_softhebb_stage1_kernel(%arg0: i32, %arg1: memref<1x1xf32, #tpu.memory_space<smem>>, %arg2: memref<16x64xf32, #tpu.memory_space<vmem>>, %arg3: memref<64x128xbf16, #tpu.memory_space<vmem>>, %arg4: memref<1x128xf32, #tpu.memory_space<vmem>>, %arg5: memref<1x128xf32, #tpu.memory_space<vmem>>, %arg6: memref<16x128xbf16, #tpu.memory_space<vmem>>, %arg7: memref<8x128xf32, #tpu.memory_space<vmem>>) attributes {dimension_semantics = [#tpu.dimension_semantics<parallel>], iteration_bounds = array<i64: 1>, scalar_prefetch = 0 : i64, scratch_operands = 0 : i64, tpu.core_type = #tpu.core_type<tc>, window_params = [{transform_indices = @transform_0, window_bounds = array<i64: 1, 1>}, {transform_indices = @transform_1, window_bounds = array<i64: 16, 64>}, {pipeline_mode = #tpu.pipeline_mode<synchronous>, transform_indices = @transform_2, window_bounds = array<i64: 64, 128>}, {pipeline_mode = #tpu.pipeline_mode<synchronous>, transform_indices = @transform_3, window_bounds = array<i64: 1, 128>}, {pipeline_mode = #tpu.pipeline_mode<synchronous>, transform_indices = @transform_4, window_bounds = array<i64: 1, 128>}, {transform_indices = @transform_5, window_bounds = array<i64: 16, 128>}, {transform_indices = @transform_6, window_bounds = array<i64: 8, 128>}]} {
    %c0 = arith.constant 0 : index
    %c0_0 = arith.constant 0 : index
    %0 = vector.load %arg2[%c0, %c0_0] : memref<16x64xf32, #tpu.memory_space<vmem>>, vector<16x64xf32>
    %c0_1 = arith.constant 0 : index
    %c0_2 = arith.constant 0 : index
    %1 = memref.load %arg1[%c0_1, %c0_2] : memref<1x1xf32, #tpu.memory_space<smem>>
    %2 = arith.mulf %0, %0 : vector<16x64xf32>
    %cst = arith.constant dense<0.000000e+00> : vector<16xf32>
    %3 = vector.multi_reduction <add>, %2, %cst [1] : vector<16x64xf32> to vector<16xf32>
    %4 = vector.shape_cast %3 : vector<16xf32> to vector<16x1xf32>
    %5 = math.sqrt %4 : vector<16x1xf32>
    %cst_3 = arith.constant 9.99999971E-10 : f32
    %6 = vector.broadcast %cst_3 : f32 to vector<16x1xf32>
    %7 = arith.addf %5, %6 : vector<16x1xf32>
    %8 = tpu.reciprocal %7 {approx = true} : vector<16x1xf32> -> vector<16x1xf32>
    %9 = arith.truncf %0 : vector<16x64xf32> to vector<16x64xbf16>
    %c0_4 = arith.constant 0 : index
    %c0_5 = arith.constant 0 : index
    %10 = vector.load %arg3[%c0_4, %c0_5] : memref<64x128xbf16, #tpu.memory_space<vmem>>, vector<64x128xbf16>
    %cst_6 = arith.constant dense<0.000000e+00> : vector<16x128xf32>
    %11 = tpu.matmul %9, %10, %cst_6 {dimension_numbers = #tpu.dot_dimension_numbers<[1], [0], [0], [1], [0, 0, 1, 1], [], []>} : vector<16x64xbf16>, vector<64x128xbf16>, vector<16x128xf32> -> vector<16x128xf32>
    %12 = vector.broadcast %8 : vector<16x1xf32> to vector<16x128xf32>
    %13 = arith.mulf %11, %12 : vector<16x128xf32>
    %c0_7 = arith.constant 0 : index
    %c0_8 = arith.constant 0 : index
    %14 = vector.load %arg4[%c0_7, %c0_8] : memref<1x128xf32, #tpu.memory_space<vmem>>, vector<1x128xf32>
    %15 = vector.broadcast %14 : vector<1x128xf32> to vector<16x128xf32>
    %16 = arith.mulf %13, %15 : vector<16x128xf32>
    %cst_9 = arith.constant 0.000000e+00 : f32
    %17 = vector.broadcast %cst_9 : f32 to vector<16x128xf32>
    %18 = arith.maximumf %16, %17 : vector<16x128xf32>
    %cst_10 = arith.constant 0.000000e+00 : f32
    %19 = vector.broadcast %cst_10 : f32 to vector<16x128xf32>
    %20 = arith.cmpf ogt, %18, %19 : vector<16x128xf32>
    %21 = math.log %18 : vector<16x128xf32>
    %22 = vector.broadcast %1 : f32 to vector<16x128xf32>
    %23 = arith.mulf %22, %21 : vector<16x128xf32>
    %c0_11 = arith.constant 0 : index
    %c0_12 = arith.constant 0 : index
    %24 = vector.load %arg5[%c0_11, %c0_12] : memref<1x128xf32, #tpu.memory_space<vmem>>, vector<1x128xf32>
    %25 = vector.broadcast %24 : vector<1x128xf32> to vector<16x128xf32>
    %26 = arith.addf %23, %25 : vector<16x128xf32>
    %27 = math.exp %26 : vector<16x128xf32>
    %cst_13 = arith.constant 0.000000e+00 : f32
    %28 = vector.broadcast %cst_13 : f32 to vector<16x128xf32>
    %29 = arith.select %20, %27, %28 : vector<16x128xi1>, vector<16x128xf32>
    %30 = arith.truncf %29 : vector<16x128xf32> to vector<16x128xbf16>
    %c0_14 = arith.constant 0 : index
    %c0_15 = arith.constant 0 : index
    %31 = vector.load %arg6[%c0_14, %c0_15] : memref<16x128xbf16, #tpu.memory_space<vmem>>, vector<16x128xbf16>
    tpu.vector_store %arg6[%c0_14, %c0_15], %30 {strides = array<i32>} : memref<16x128xbf16, #tpu.memory_space<vmem>>, vector<16x128xbf16>,
    %cst_16 = arith.constant dense<0xFF800000> : vector<16xf32>
    %32 = vector.multi_reduction <maximumf>, %18, %cst_16 [1] : vector<16x128xf32> to vector<16xf32>
    %33 = vector.shape_cast %32 : vector<16xf32> to vector<16x1xf32>
    %cst_17 = arith.constant dense<0xFF800000> : vector<1xf32>
    %34 = vector.multi_reduction <maximumf>, %33, %cst_17 [0] : vector<16x1xf32> to vector<1xf32>
    %35 = vector.shape_cast %34 : vector<1xf32> to vector<1x1xf32>
    %36 = vector.shape_cast %35 : vector<1x1xf32> to vector<1x1xf32>
    %37 = vector.broadcast %36 : vector<1x1xf32> to vector<8x128xf32>
    %c0_18 = arith.constant 0 : index
    %c0_19 = arith.constant 0 : index
    %38 = vector.load %arg7[%c0_18, %c0_19] : memref<8x128xf32, #tpu.memory_space<vmem>>, vector<8x128xf32>
    tpu.vector_store %arg7[%c0_18, %c0_19], %37 {strides = array<i32>} : memref<8x128xf32, #tpu.memory_space<vmem>>, vector<8x128xf32>,
    return
  }
  func.func @transform_0(%arg0: i32) -> (i32, i32) {
    %c0_i32 = arith.constant 0 : i32
    %c0_i32_0 = arith.constant 0 : i32
    %c0_i32_1 = arith.constant 0 : i32
    return %c0_i32, %c0_i32_0 : i32, i32
  }
  func.func @transform_1(%arg0: i32) -> (i32, i32) {
    %c0_i32 = arith.constant 0 : i32
    %c0_i32_0 = arith.constant 0 : i32
    return %arg0, %c0_i32 : i32, i32
  }
  func.func @transform_2(%arg0: i32) -> (i32, i32) {
    %c0_i32 = arith.constant 0 : i32
    %c0_i32_0 = arith.constant 0 : i32
    %c0_i32_1 = arith.constant 0 : i32
    return %c0_i32, %c0_i32_0 : i32, i32
  }
  func.func @transform_3(%arg0: i32) -> (i32, i32) {
    %c0_i32 = arith.constant 0 : i32
    %c0_i32_0 = arith.constant 0 : i32
    %c0_i32_1 = arith.constant 0 : i32
    return %c0_i32, %c0_i32_0 : i32, i32
  }
  func.func @transform_4(%arg0: i32) -> (i32, i32) {
    %c0_i32 = arith.constant 0 : i32
    %c0_i32_0 = arith.constant 0 : i32
    %c0_i32_1 = arith.constant 0 : i32
    return %c0_i32, %c0_i32_0 : i32, i32
  }
  func.func @transform_5(%arg0: i32) -> (i32, i32) {
    %c0_i32 = arith.constant 0 : i32
    %c0_i32_0 = arith.constant 0 : i32
    return %arg0, %c0_i32 : i32, i32
  }
  func.func @transform_6(%arg0: i32) -> (i32, i32) {
    %c0_i32 = arith.constant 0 : i32
    %c0_i32_0 = arith.constant 0 : i32
    return %arg0, %c0_i32 : i32, i32
  }
}

</mosaic_0001>

<bundles_post_ra>
// kernel: softhebb_forward.3
= control target key start
LH: loop header
LB: loop body
LE: loop exit
PB: predicated region body
PF: predicated region fallthrough
CT: control target
= control target key end

     0   :  { %s77_s1 = inlined_call_operand.vmem [shape: bf16[16,128], index: 1, kind: input, shape index: {}]   ;;  %s78_s0 = inlined_call_operand.<no memory space> [shape: f32[1,1], index: 0, kind: input, shape index: {}]   ;;  %s79_s2 = inlined_call_operand.vmem [shape: f32[16,128], index: 2, kind: output, shape index: {}]  }
   0x1   :  { %v43_v0 = vld [vmem:[%s77_s1] sm:$0xff]   ;;  %v21_v3 = vstv %s78_s0 }
   0x2   :  { %v44_v1 = vunpack.c.l.bf16 %v43_v0  ;;  %v45_v2 = vunpack.c.h.bf16 %v43_v0 }
   0x4   :  { %17 = vadd.xlane.f32.xlu0 %v44_v1 }
   0x8   :  { %19 = vadd.xlane.f32.xlu0 %v45_v2 }
  0x91   :  { %v18_v4 = vpop.xlane.xlu0 %17 }
  0x92   :  { %v22_v5 = vadd.f32 %v21_v3, %v18_v4  ;;  %vm26_vm0 = vcmp.gt.f32.partialorder %v18_v4, 0.0 }
  0x94   :  { %46 = vrcp.f32 %v22_v5 }
  0x95   :  { %v20_v6 = vpop.xlane.xlu0 %19 }
  0x96   :  { %v23_v7 = vadd.f32 %v21_v3, %v20_v6  ;;  %vm27_vm1 = vcmp.gt.f32.partialorder %v20_v6, 0.0 }
  0x98   :  { %48 = vrcp.f32 %v23_v7 }
  0x9e   :  { %v47_v8 = vpop.eup %46 }
  0x9f   :  { %v28_v9 = vmul.f32 %v47_v8, %v44_v1 }
  0xa1   :  { %v34_v10 = vsel %vm26_vm0, %v28_v9, 0.0 }
  0xa2   :  { %v49_v11 = vpop.eup %48  ;;  %36 = vst [vmem:[%s79_s2] sm:$0xff] %v34_v10 }
  0xa3   :  { %v29_v12 = vmul.f32 %v49_v11, %v45_v2 }
  0xa5   :  { %v35_v13 = vsel %vm27_vm1, %v29_v12, 0.0 }
  0xa6   :  { %37 = vst [vmem:[%s79_s2 + $0x8] sm:$0xff] %v35_v13 }

// kernel: softhebb_forward.2
= control target key start
LH: loop header
LB: loop body
LE: loop exit
PB: predicated region body
PF: predicated region fallthrough
CT: control target
= control target key end

     0   :  { %v253_v0 = vmov 0.0   ;;  %vm254_vm0 = vmmov 0   ;;  %vm29_vm1 = vcmask 523264   ;;  %s323_s2 = inlined_call_operand.vmem [shape: bf16[64,128], index: 2, kind: input, shape index: {}]   ;;  %s324_s1 = inlined_call_operand.vmem [shape: f32[16,64], index: 1, kind: input, shape index: {}]   ;;  %s325_s3 = inlined_call_operand.vmem [shape: f32[1,128], index: 3, kind: input, shape index: {}]   ;;  %s326_s0 = inlined_call_operand.<no memory space> [shape: f32[1,1], index: 0, kind: input, shape index: {}]   ;;  %s327_s4 = inlined_call_operand.vmem [shape: f32[1,128], index: 4, kind: input, shape index: {}]   ;;  %s328_s5 = inlined_call_operand.vmem [shape: bf16[16,128], index: 5, kind: output, shape index: {0}]   ;;  %s329_s6 = inlined_call_operand.vmem [shape: f32[8,128], index: 6, kind: output, shape index: {1}]  }
   0x1   :  { %219 = vmatprep.subr.bf16.mxu0 %v253_v0  ;;  %v233_v1 = vld [vmem:[%s323_s2] sm:$0xff]   ;;  %227 = vmatprep.mubr.msk.bf16.mxu0 %vm254_vm0, %v253_v0  ;;  %v234_v2 = vld [vmem:[%s323_s2 + $0x8] sm:$0xff]   ;;  %v235_v7 = vld [vmem:[%s323_s2 + $0x10] sm:$0xff]   ;;  %v150_v40 = vstv %s326_s0 }
   0x2   :  { %220 = vmatpush3.bf16.msra.mxu0 %v233_v1  ;;  %v24_v3 = vld [vmem:[%s324_s1] sm:$0xff]  ;;  %v25_v4 = vld [vmem:[%s324_s1 + $0x8] sm:$0xff]  ;;  %v236_v10 = vld [vmem:[%s323_s2 + $0x18] sm:$0xff]  }
   0x3   :  { %221 = vmatprep.subr.bf16.mxu0 %v253_v0  ;;  %v27_v5 = vmul.f32 %v24_v3, %v24_v3  ;;  %v28_v6 = vmul.f32 %v25_v4, %v25_v4  ;;  %v54_v11 = vpack.c.bf16 %v25_v4, %v24_v3  ;;  %v203_v28 = vld [vmem:[%s325_s3] ss:$0 sm:$0xff] }
   0x4   :  { %v204_v43 = vld [vmem:[%s327_s4] ss:$0 sm:$0xff] }
   0x5   :  { %v30_v8 = vsel %vm29_vm1, %v27_v5, 0.0  ;;  %v33_v9 = vsel %vm29_vm1, %v28_v6, 0.0 }
   0x6   :  { %222 = vmatpush3.bf16.msra.mxu0 %v234_v2  ;;  %31 = vadd.xlane.f32.xlu0 %v30_v8 }
   0x7   :  { %223 = vmatprep.subr.bf16.mxu0 %v253_v0 }
   0xa   :  { %224 = vmatpush3.bf16.msra.mxu0 %v235_v7  ;;  %34 = vadd.xlane.f32.xlu0 %v33_v9 }
   0xb   :  { %225 = vmatprep.subr.bf16.mxu0 %v253_v0 }
   0xe   :  { %226 = vmatpush3.bf16.msra.mxu0 %v236_v10 }
  0x11   :  { %228 = vmatmul.mubr.msk.bf16.vlgmr.msra.gmra.mrb[0].mxu0 %vm29_vm1, %v54_v11 }
  0x93   :  { %v32_v12 = vpop.xlane.xlu0 %31 }
  0x94   :  { %237 = vrsqrt.f32 %v32_v12  ;;  %vm38_vm2 = vcmp.eq.f32.partialorder %v32_v12, inf  ;;  %v41_v18 = vand.u32 2147483648, %v32_v12  ;;  %vm40_vm4 = vcmp.eq.f32.partialorder %v32_v12, 0.0 }
  0x97   :  { %v35_v13 = vpop.xlane.xlu0 %34 }
  0x98   :  { %239 = vrsqrt.f32 %v35_v13  ;;  %vm45_vm3 = vcmp.eq.f32.partialorder %v35_v13, inf  ;;  %v48_v20 = vand.u32 2147483648, %v35_v13  ;;  %vm47_vm5 = vcmp.eq.f32.partialorder %v35_v13, 0.0 }
  0x9e   :  { %v238_v14 = vpop.eup %237 }
  0x9f   :  { %v37_v16 = vmul.f32 %v238_v14, %v32_v12 }
  0xa1   :  { %v39_v19 = vsel %vm38_vm2, %v32_v12, %v37_v16 }
  0xa2   :  { %v240_v15 = vpop.eup %239  ;;  %v42_v22 = vsel %vm40_vm4, %v41_v18, %v39_v19 }
  0xa3   :  { %v44_v17 = vmul.f32 %v240_v15, %v35_v13  ;;  %v50_v24 = vadd.f32 1e-09, %v42_v22 }
  0xa5   :  { %v46_v21 = vsel %vm45_vm3, %v35_v13, %v44_v17  ;;  %241 = vrcp.f32 %v50_v24 }
  0xa6   :  { %v49_v23 = vsel %vm47_vm5, %v48_v20, %v46_v21 }
  0xa7   :  { %v51_v25 = vadd.f32 1e-09, %v49_v23 }
  0xa9   :  { %243 = vrcp.f32 %v51_v25 }
  0xaf   :  { %v242_v26 = vpop.eup %241 }
  0xb3   :  { %v244_v31 = vpop.eup %243 }
  0xe4   :  { %v124_v27 = vpop.f32.mrb[0].mxu0 }
  0xe5   :  { %v131_v29 = vmul.f32 %v242_v26, %v124_v27  ;;  %v229_v30 = vpop.f32.mrb[1].mxu0 }
  0xe6   :  { %v127_v32 = vpop.f32.mrb[2].mxu0 }
  0xe7   :  { %v140_v33 = vmul.f32 %v203_v28, %v131_v29  ;;  %v132_v34 = vmul.f32 %v244_v31, %v127_v32  ;;  %v230_v35 = vpop.f32.mrb[3].mxu0 }
  0xe9   :  { %v142_v36 = vmax.f32 %v140_v33, 0.0  ;;  %v141_v37 = vmul.f32 %v203_v28, %v132_v34 }
  0xeb   :  { %245 = vlog2.f32 %v142_v36  ;;  %v143_v38 = vmax.f32 %v141_v37, 0.0  ;;  %178 = vmax.xlane.f32.xlu1 %v142_v36  ;;  %vm144_vm6 = vcmp.gt.f32.partialorder %v142_v36, 0.0 }
  0xed   :  { %247 = vlog2.f32 %v143_v38  ;;  %vm145_vm7 = vcmp.gt.f32.partialorder %v143_v38, 0.0 }
  0xef   :  { %180 = vmax.xlane.f32.xlu1 %v143_v38 }
  0xf5   :  { %v246_v39 = vpop.eup %245 }
  0xf6   :  { %v147_v41 = vmul.f32 0.6931472, %v246_v39 }
  0xf7   :  { %v248_v42 = vpop.eup %247 }
  0xf8   :  { %v151_v44 = vmul.f32 %v150_v40, %v147_v41  ;;  %v149_v45 = vmul.f32 0.6931472, %v248_v42 }
  0xfa   :  { %v160_v46 = vadd.f32 %v204_v43, %v151_v44  ;;  %v152_v47 = vmul.f32 %v150_v40, %v149_v45 }
  0xfc   :  { %v162_v48 = vmul.f32 1.442695, %v160_v46  ;;  %v161_v49 = vadd.f32 %v204_v43, %v152_v47 }
  0xfe   :  { %249 = vpow2.f32 %v162_v48  ;;  %v164_v50 = vmul.f32 1.442695, %v161_v49 }
 0x100   :  { %251 = vpow2.f32 %v164_v50 }
 0x108   :  { %v250_v51 = vpop.eup %249 }
 0x109   :  { %v166_v53 = vsel %vm144_vm6, %v250_v51, 0.0 }
 0x10a   :  { %v252_v52 = vpop.eup %251 }
 0x10b   :  { %v167_v54 = vsel %vm145_vm7, %v252_v52, 0.0 }
 0x10c   :  { %v212_v55 = vpack.c.bf16 %v167_v54, %v166_v53 }
 0x10e   :  { %213 = vst [vmem:[%s328_s5] sm:$0xff] %v212_v55  }
 0x178   :  { %v179_v56 = vpop.xlane.xlu1 %178 }
 0x17c   :  { %v181_v57 = vpop.xlane.xlu1 %180 }
 0x17d   :  { %v182_v58 = vmax.f32 %v179_v56, %v181_v57 }
 0x17f   :  { %v183_v59 = vrot.slane %v182_v58, 4 }
 0x181   :  { %v184_v60 = vmax.f32 %v182_v58, %v183_v59 }
 0x183   :  { %v185_v61 = vrot.slane %v184_v60, 2 }
 0x185   :  { %v186_v62 = vmax.f32 %v184_v60, %v185_v61 }
 0x187   :  { %v187_v63 = vrot.slane %v186_v62, 1 }
 0x189   :  { %v188_v0 = vmax.f32 %v186_v62, %v187_v63 }
 0x18b   :  { %189 = vst [vmem:[%s329_s6] sm:$0xff] %v188_v0 }

</bundles_post_ra>
